<compile_context>
chip_gen: v7x
topology: tpu7x:2x2x1
jax: 0.10.0
libtpu: 0.0.40
codegen_flags: <defaults>
</compile_context>

<pallas_src>
import math
import functools

import jax
import jax.numpy as jnp
from jax import lax
from jax.experimental import pallas as pl
from jax.experimental.pallas import tpu as pltpu


def _round_up(x, m):
    return ((x + m - 1) // m) * m


def _tpu_defaults():
    """Per-generation tile defaults / VMEM budget (conservative fallback)."""
    vmem_cap = 64 * 1024 * 1024
    try:
        info = pltpu.get_tpu_info()
        vmem_cap = int(getattr(info, "vmem_capacity_bytes", vmem_cap))
    except Exception:
        pass
    if vmem_cap >= 100 * 1024 * 1024:
        # v5e / v6e: 128 MiB VMEM -> big tiles, generous scoped limit.
        return dict(tm=1024, th=1024, vmem_limit=100 * 1024 * 1024)
    # v7x (64 MiB / TC) or unknown: capped tiles, tighter scoped limit.
    return dict(tm=512, th=512, vmem_limit=48 * 1024 * 1024)


def _pick_th(H, target):
    """Largest lane-legal hidden tile <= target that divides H.

    th must be a multiple of 128 (lane dim of the W1 tile / sublane dim of the
    W2 tile) or equal to H. Never falls back to full-H for lane-legal H, so the
    hidden-axis pipeline stays pipelined and weights are never fully resident.
    """
    target = min(target, H)
    if H % 128 != 0:
        return H  # only legal choice for non-128-multiple H (tiny models)
    t = max(128, target - (target % 128))
    while t > 128 and H % t != 0:
        t -= 128
    return t


def _vmem_estimate(tm, th, E, op_bytes, out_bytes):
    """Rough double-buffered working-set size in bytes."""
    return (2 * tm * E * op_bytes        # x row tile
            + 2 * tm * E * out_bytes     # output tile
            + 2 * E * th * op_bytes      # W1 column tile
            + 2 * th * E * op_bytes      # W2 row tile
            + 2 * 4 * (th + E)           # biases
            + 4 * tm * E)                # f32 accumulator scratch


def ffn_kernel(x_ref, w1_ref, b1_ref, w2_ref, b2_ref, o_ref, acc_ref, *,
               approximate_gelu):
    # x_ref:  (tm, E)   row tile of flattened tokens (resident across h steps)
    # w1_ref: (E, th)   column tile of W1,   b1_ref: (1, th)
    # w2_ref: (th, E)   row tile of W2,      b2_ref: (1, E)
    # o_ref:  (tm, E)   output tile (written at the last h step)
    # acc_ref:(tm, E)   f32 accumulator scratch
    h_idx = pl.program_id(1)

    @pl.when(h_idx == 0)
    def _():
        acc_ref[...] = jnp.zeros_like(acc_ref)

    # fc1 partial: (tm, th), f32 accumulation on the MXU.
    h = jnp.dot(x_ref[...], w1_ref[...], preferred_element_type=jnp.float32)
    h = h + b1_ref[...].astype(jnp.float32)

    if approximate_gelu:
        # tanh-approx GELU: transcendental goes through the EUP slot,
        # keeping the VALU free for the rest of the elementwise work.
        c = math.sqrt(2.0 / math.pi)
        h = 0.5 * h * (1.0 + jnp.tanh(c * (h + 0.044715 * h * h * h)))
    else:
        # exact GELU (matches torch.nn.GELU default: 0.5*x*(1+erf(x/sqrt(2))))
        h = 0.5 * h * (1.0 + lax.erf(h * (1.0 / math.sqrt(2.0))))

    # fc2 partial, accumulated over the hidden-dim grid axis.
    acc_ref[...] += jnp.dot(
        h.astype(w2_ref.dtype), w2_ref[...], preferred_element_type=jnp.float32
    )

    @pl.when(h_idx == pl.num_programs(1) - 1)
    def _():
        out = acc_ref[...] + b2_ref[...].astype(jnp.float32)
        o_ref[...] = out.astype(o_ref.dtype)  # dropout (eval) == identity


def ffn_pallas(x, w1, b1, w2, b2, *, tm=None, th=None, matmul_dtype="auto",
               approximate_gelu=False, vmem_limit_bytes=None,
               weight_buffers=None):
    """x: (B, T, E). w1: (E, 4E), b1: (4E,), w2: (4E, E), b2: (E,).

    Weights are stored transposed vs. PyTorch Linear (i.e. (in, out)).
    matmul_dtype: "auto" (bf16 iff x is bf16), None (keep x dtype), or a dtype.
    approximate_gelu=True uses the tanh-approx GELU (faster, EUP-bound) instead
    of torch's exact erf default.
    weight_buffers: optional pipelining depth (pl.Buffered) for the two weight
    streams; leave None unless profiling shows exposed weight DMA.
    """
    B, T, E = x.shape
    E_in, H = w1.shape
    assert E_in == E and w2.shape == (H, E) and b1.shape == (H,) and b2.shape == (E,)
    out_dtype = x.dtype

    if matmul_dtype == "auto":
        matmul_dtype = jnp.bfloat16 if x.dtype == jnp.bfloat16 else None

    defaults = _tpu_defaults()
    auto_tm = tm is None
    if tm is None:
        tm = defaults["tm"]
    if th is None:
        th = defaults["th"]
    if vmem_limit_bytes is None:
        vmem_limit_bytes = defaults["vmem_limit"]

    N = B * T

    # Row tile: multiple of 8 sublanes, no larger than the padded row count.
    tm = max(8, min(tm, _round_up(N, 8)))
    if auto_tm and N > 8:
        # Megacore: keep >= 2 row tiles so the "parallel" axis can shard
        # across both v7x TensorCores.
        tm = min(tm, max(8, _round_up((N + 1) // 2, 8)))
    tm = _round_up(tm, 8)

    # Hidden tile: largest lane-legal divisor of H no larger than the target.
    th = _pick_th(H, th)

    # Shrink tiles until the double-buffered working set fits the VMEM budget.
    op_bytes = jnp.dtype(matmul_dtype).itemsize if matmul_dtype is not None \
        else jnp.dtype(x.dtype).itemsize
    out_bytes = jnp.dtype(out_dtype).itemsize
    budget = int(0.9 * vmem_limit_bytes)
    for _ in range(32):
        if _vmem_estimate(tm, th, E, op_bytes, out_bytes) <= budget:
            break
        if tm > 256 and (tm >= th or th <= 256):
            tm = max(256, _round_up(tm // 2, 8))
        elif th > 256:
            new_th = _pick_th(H, th // 2)
            if new_th == th:
                break
            th = new_th
        else:
            break

    n_pad = _round_up(N, tm)

    x_flat = x.reshape(N, E)
    if n_pad != N:
        x_flat = jnp.pad(x_flat, ((0, n_pad - N), (0, 0)))

    if matmul_dtype is not None:
        # Only cast when needed; pass pre-cast bf16 weights to skip this.
        if x_flat.dtype != matmul_dtype:
            x_flat = x_flat.astype(matmul_dtype)
        if w1.dtype != matmul_dtype:
            w1 = w1.astype(matmul_dtype)
        if w2.dtype != matmul_dtype:
            w2 = w2.astype(matmul_dtype)

    b1_2d = b1.reshape(1, H).astype(jnp.float32)
    b2_2d = b2.reshape(1, E).astype(jnp.float32)

    grid = (n_pad // tm, H // th)

    def _weight_spec(shape, idx_map):
        if weight_buffers is None:
            return pl.BlockSpec(shape, idx_map)
        return pl.BlockSpec(shape, idx_map,
                            pipeline_mode=pl.Buffered(weight_buffers))

    out_flat = pl.pallas_call(
        functools.partial(ffn_kernel, approximate_gelu=approximate_gelu),
        out_shape=jax.ShapeDtypeStruct((n_pad, E), out_dtype),
        grid_spec=pltpu.PrefetchScalarGridSpec(
            num_scalar_prefetch=0,
            grid=grid,
            in_specs=[
                pl.BlockSpec((tm, E), lambda i, h: (i, 0)),     # x row tile
                _weight_spec((E, th), lambda i, h: (0, h)),     # W1 column tile
                pl.BlockSpec((1, th), lambda i, h: (0, h)),     # b1 tile
                _weight_spec((th, E), lambda i, h: (h, 0)),     # W2 row tile
                pl.BlockSpec((1, E), lambda i, h: (0, 0)),      # b2 (full)
            ],
            out_specs=pl.BlockSpec((tm, E), lambda i, h: (i, 0)),
            scratch_shapes=[pltpu.VMEM((tm, E), jnp.float32)],
        ),
        compiler_params=pltpu.CompilerParams(
            dimension_semantics=("parallel", "arbitrary"),
            vmem_limit_bytes=vmem_limit_bytes,
        ),
    )(x_flat, w1, b1_2d, w2, b2_2d)

    return out_flat[:N].reshape(B, T, E)


def reference_ffn(x, w1, b1, w2, b2):
    h = x.astype(jnp.float32) @ w1 + b1
    h = 0.5 * h * (1.0 + lax.erf(h / jnp.sqrt(2.0).astype(jnp.float32)))
    return h @ w2 + b2


def _make_params(key, E, H):
    k1, k2, k3, k4 = jax.random.split(key, 4)
    # PyTorch-Linear-like uniform init (bound 1/sqrt(fan_in)), stored (in, out).
    bound1 = 1.0 / math.sqrt(E)
    w1 = jax.random.uniform(k1, (E, H), minval=-bound1, maxval=bound1,
                            dtype=jnp.float32)
    b1 = jax.random.uniform(k2, (H,), minval=-bound1, maxval=bound1,
                            dtype=jnp.float32)
    bound2 = 1.0 / math.sqrt(H)
    w2 = jax.random.uniform(k3, (H, E), minval=-bound2, maxval=bound2,
                            dtype=jnp.float32)
    b2 = jax.random.uniform(k4, (E,), minval=-bound2, maxval=bound2,
                            dtype=jnp.float32)
    return w1, b1, w2, b2


if __name__ == "__main__":
    key = jax.random.PRNGKey(0)
    k_x, k_p, k_x2, k_p2, k_x3, k_p3 = jax.random.split(key, 6)

    # --- Test 1: embedding_size=32 (H=128), batch=2, seq=8, f32, auto tiles.
    B, T, E = 2, 8, 32
    H = 4 * E
    x = jax.random.normal(k_x, (B, T, E), dtype=jnp.float32)
    w1, b1, w2, b2 = _make_params(k_p, E, H)

    out = jax.block_until_ready(ffn_pallas(x, w1, b1, w2, b2))
    ref = reference_ffn(x, w1, b1, w2, b2)
    assert out.shape == (B, T, E)
    assert jnp.allclose(out, ref, atol=1e-5, rtol=1e-5), "f32 mismatch vs reference"

    # --- Test 2: uneven N (padding path), explicit small tiles, multi-step grid.
    B2, T2, E2 = 2, 10, 64
    H2 = 4 * E2
    x2 = jax.random.normal(k_x2, (B2, T2, E2), dtype=jnp.float32)
    p2 = _make_params(k_p2, E2, H2)

    out2 = jax.block_until_ready(ffn_pallas(x2, *p2, tm=8, th=128))
    ref2 = reference_ffn(x2, *p2)
    assert jnp.allclose(out2, ref2, atol=1e-5, rtol=1e-5), "tiled mismatch vs reference"

    # --- Test 3: bf16 MXU operands (f32 accumulation), auto tiles, looser tol.
    out3 = jax.block_until_ready(ffn_pallas(x2, *p2, matmul_dtype=jnp.bfloat16))
    assert jnp.allclose(out3, ref2, atol=5e-2, rtol=5e-2), "bf16 mismatch vs reference"

    # --- Test 4: bf16 inputs (auto -> bf16 matmul), auto tiles with megacore
    #     split (grid[0] >= 2), tanh-approx GELU path.
    B3, T3, E3 = 4, 64, 128
    H3 = 4 * E3
    x3 = jax.random.normal(k_x3, (B3, T3, E3), dtype=jnp.float32)
    p3 = _make_params(k_p3, E3, H3)

    out4 = jax.block_until_ready(
        ffn_pallas(x3.astype(jnp.bfloat16), *p3, approximate_gelu=True))
    ref4 = reference_ffn(x3, *p3)
    assert out4.dtype == jnp.bfloat16
    assert jnp.allclose(out4.astype(jnp.float32), ref4, atol=5e-2, rtol=5e-2), \
        "bf16 tanh-GELU mismatch vs reference"

    print("KERNEL_OK")
</pallas_src>

<mosaic_0001>
module attributes {stable_mosaic.version = 11 : i64} {
  func.func @ffn_kernel(%arg0: i32, %arg1: i32, %arg2: memref<8x32xf32, #tpu.memory_space<vmem>>, %arg3: memref<32x128xf32, #tpu.memory_space<vmem>>, %arg4: memref<1x128xf32, #tpu.memory_space<vmem>>, %arg5: memref<128x32xf32, #tpu.memory_space<vmem>>, %arg6: memref<1x32xf32, #tpu.memory_space<vmem>>, %arg7: memref<8x32xf32, #tpu.memory_space<vmem>>, %arg8: memref<8x32xf32, #tpu.memory_space<vmem>>) attributes {dimension_semantics = [#tpu.dimension_semantics<parallel>, #tpu.dimension_semantics<arbitrary>], iteration_bounds = array<i64: 2, 1>, scalar_prefetch = 0 : i64, scratch_operands = 1 : i64, tpu.core_type = #tpu.core_type<tc>, window_params = [{transform_indices = @transform_0, window_bounds = array<i64: 8, 32>}, {transform_indices = @transform_1, window_bounds = array<i64: 32, 128>}, {transform_indices = @transform_2, window_bounds = array<i64: 1, 128>}, {transform_indices = @transform_3, window_bounds = array<i64: 128, 32>}, {pipeline_mode = #tpu.pipeline_mode<synchronous>, transform_indices = @transform_4, window_bounds = array<i64: 1, 32>}, {transform_indices = @transform_5, window_bounds = array<i64: 8, 32>}]} {
    %c0_i32 = arith.constant 0 : i32
    %0 = arith.cmpi eq, %arg1, %c0_i32 : i32
    %1 = arith.extui %0 : i1 to i32
    %c0_i32_0 = arith.constant 0 : i32
    %2 = arith.cmpi ne, %1, %c0_i32_0 : i32
    scf.if %2 {
      %cst_18 = arith.constant 0.000000e+00 : f32
      %25 = vector.broadcast %cst_18 : f32 to vector<8x32xf32>
      %c0_19 = arith.constant 0 : index
      %c0_20 = arith.constant 0 : index
      %26 = vector.load %arg8[%c0_19, %c0_20] : memref<8x32xf32, #tpu.memory_space<vmem>>, vector<8x32xf32>
      tpu.vector_store %arg8[%c0_19, %c0_20], %25 {strides = array<i32>} : memref<8x32xf32, #tpu.memory_space<vmem>>, vector<8x32xf32>,
    } else {
    }
    %c0 = arith.constant 0 : index
    %c0_1 = arith.constant 0 : index
    %3 = vector.load %arg2[%c0, %c0_1] : memref<8x32xf32, #tpu.memory_space<vmem>>, vector<8x32xf32>
    %c0_2 = arith.constant 0 : index
    %c0_3 = arith.constant 0 : index
    %4 = vector.load %arg3[%c0_2, %c0_3] : memref<32x128xf32, #tpu.memory_space<vmem>>, vector<32x128xf32>
    %cst = arith.constant dense<0.000000e+00> : vector<8x128xf32>
    %5 = tpu.matmul %3, %4, %cst {dimension_numbers = #tpu.dot_dimension_numbers<[1], [0], [0], [1], [0, 0, 1, 1], [], []>} : vector<8x32xf32>, vector<32x128xf32>, vector<8x128xf32> -> vector<8x128xf32>
    %c0_4 = arith.constant 0 : index
    %c0_5 = arith.constant 0 : index
    %6 = vector.load %arg4[%c0_4, %c0_5] : memref<1x128xf32, #tpu.memory_space<vmem>>, vector<1x128xf32>
    %7 = vector.broadcast %6 : vector<1x128xf32> to vector<8x128xf32>
    %8 = arith.addf %5, %7 : vector<8x128xf32>
    %cst_6 = arith.constant 5.000000e-01 : f32
    %9 = vector.broadcast %cst_6 : f32 to vector<8x128xf32>
    %10 = arith.mulf %9, %8 : vector<8x128xf32>
    %cst_7 = arith.constant 0.707106769 : f32
    %11 = vector.broadcast %cst_7 : f32 to vector<8x128xf32>
    %12 = arith.mulf %8, %11 : vector<8x128xf32>
    %13 = math.erf %12 : vector<8x128xf32>
    %cst_8 = arith.constant 1.000000e+00 : f32
    %14 = vector.broadcast %cst_8 : f32 to vector<8x128xf32>
    %15 = arith.addf %14, %13 : vector<8x128xf32>
    %16 = arith.mulf %10, %15 : vector<8x128xf32>
    %c0_9 = arith.constant 0 : index
    %c0_10 = arith.constant 0 : index
    %17 = vector.load %arg8[%c0_9, %c0_10] : memref<8x32xf32, #tpu.memory_space<vmem>>, vector<8x32xf32>
    %c0_11 = arith.constant 0 : index
    %c0_12 = arith.constant 0 : index
    %18 = vector.load %arg5[%c0_11, %c0_12] : memref<128x32xf32, #tpu.memory_space<vmem>>, vector<128x32xf32>
    %cst_13 = arith.constant dense<0.000000e+00> : vector<8x32xf32>
    %19 = tpu.matmul %16, %18, %cst_13 {dimension_numbers = #tpu.dot_dimension_numbers<[1], [0], [0], [1], [0, 0, 1, 1], [], []>} : vector<8x128xf32>, vector<128x32xf32>, vector<8x32xf32> -> vector<8x32xf32>
    %20 = arith.addf %17, %19 : vector<8x32xf32>
    %c0_14 = arith.constant 0 : index
    %c0_15 = arith.constant 0 : index
    %21 = vector.load %arg8[%c0_14, %c0_15] : memref<8x32xf32, #tpu.memory_space<vmem>>, vector<8x32xf32>
    tpu.vector_store %arg8[%c0_14, %c0_15], %20 {strides = array<i32>} : memref<8x32xf32, #tpu.memory_space<vmem>>, vector<8x32xf32>,
    %c0_i32_16 = arith.constant 0 : i32
    %22 = arith.cmpi eq, %arg1, %c0_i32_16 : i32
    %23 = arith.extui %22 : i1 to i32
    %c0_i32_17 = arith.constant 0 : i32
    %24 = arith.cmpi ne, %23, %c0_i32_17 : i32
    scf.if %24 {
      %c0_18 = arith.constant 0 : index
      %c0_19 = arith.constant 0 : index
      %25 = vector.load %arg8[%c0_18, %c0_19] : memref<8x32xf32, #tpu.memory_space<vmem>>, vector<8x32xf32>
      %c0_20 = arith.constant 0 : index
      %c0_21 = arith.constant 0 : index
      %26 = vector.load %arg6[%c0_20, %c0_21] : memref<1x32xf32, #tpu.memory_space<vmem>>, vector<1x32xf32>
      %27 = vector.broadcast %26 : vector<1x32xf32> to vector<8x32xf32>
      %28 = arith.addf %25, %27 : vector<8x32xf32>
      %c0_22 = arith.constant 0 : index
      %c0_23 = arith.constant 0 : index
      %29 = vector.load %arg7[%c0_22, %c0_23] : memref<8x32xf32, #tpu.memory_space<vmem>>, vector<8x32xf32>
      tpu.vector_store %arg7[%c0_22, %c0_23], %28 {strides = array<i32>} : memref<8x32xf32, #tpu.memory_space<vmem>>, vector<8x32xf32>,
    } else {
    }
    return
  }
  func.func @transform_0(%arg0: i32, %arg1: i32) -> (i32, i32) {
    %c0_i32 = arith.constant 0 : i32
    %c0_i32_0 = arith.constant 0 : i32
    return %arg0, %c0_i32 : i32, i32
  }
  func.func @transform_1(%arg0: i32, %arg1: i32) -> (i32, i32) {
    %c0_i32 = arith.constant 0 : i32
    %c0_i32_0 = arith.constant 0 : i32
    return %c0_i32, %arg1 : i32, i32
  }
  func.func @transform_2(%arg0: i32, %arg1: i32) -> (i32, i32) {
    %c0_i32 = arith.constant 0 : i32
    %c0_i32_0 = arith.constant 0 : i32
    return %c0_i32, %arg1 : i32, i32
  }
  func.func @transform_3(%arg0: i32, %arg1: i32) -> (i32, i32) {
    %c0_i32 = arith.constant 0 : i32
    %c0_i32_0 = arith.constant 0 : i32
    return %arg1, %c0_i32 : i32, i32
  }
  func.func @transform_4(%arg0: i32, %arg1: i32) -> (i32, i32) {
    %c0_i32 = arith.constant 0 : i32
    %c0_i32_0 = arith.constant 0 : i32
    %c0_i32_1 = arith.constant 0 : i32
    return %c0_i32, %c0_i32_0 : i32, i32
  }
  func.func @transform_5(%arg0: i32, %arg1: i32) -> (i32, i32) {
    %c0_i32 = arith.constant 0 : i32
    %c0_i32_0 = arith.constant 0 : i32
    return %arg0, %c0_i32 : i32, i32
  }
}

</mosaic_0001>

<bundles_post_ra>
// kernel: tpu_custom_call.1
= control target key start
LH: loop header
LB: loop body
LE: loop exit
PB: predicated region body
PF: predicated region fallthrough
CT: control target
= control target key end

     0   :  { %10 = vsyncpa [#allocation4], 0  ;;  %s1078_s0 = inlined_call_operand.vmem [shape: f32[16,32], index: 0, kind: input, shape index: {}]   ;;  %s1079_s1 = inlined_call_operand.vmem [shape: f32[32,128], index: 1, kind: input, shape index: {}]   ;;  %s1080_s2 = inlined_call_operand.vmem [shape: f32[1,128], index: 2, kind: input, shape index: {}]   ;;  %s1081_s3 = inlined_call_operand.vmem [shape: f32[128,32], index: 3, kind: input, shape index: {}]   ;;  %s1082_s4 = inlined_call_operand.vmem [shape: f32[1,32], index: 4, kind: input, shape index: {}]   ;;  %s1083_s5 = inlined_call_operand.hbm [shape: f32[16,32], index: 5, kind: output, shape index: {}]  }
   0x1   :  { %12 = vsyncpa [#allocation4 + $0x1], 0  ;;  %s896_s18 = smov 0   ;;  %s898_s19 = smov 0  }
   0x2   :  { %s900_s20 = smov 0   ;;  %s902_s21 = smov 0  }
   0x3   :  { %s904_s22 = smov 0   ;;  %s906_s23 = smov 0  }
   0x4 LB: > { %s607_s24 = sadd.s32 4294967295, %s860_s23   ;;  %s608_s25 = sadd.s32 4294967294, %s860_s23   ;;  %s860_s23 = sphi %s906_s23, %s18_s23   ;;  %s856_s22 = sphi %s904_s22, %s1090_s22   ;;  %s852_s21 = sphi %s902_s21, %s1089_s21   ;;  %s848_s20 = sphi %s900_s20, %s1088_s20   ;;  %s844_s19 = sphi %s898_s19, %s1087_s19   ;;  %s840_s18 = sphi %s896_s18, %s1086_s18  }
   0x5   : > { %s30_s26 = sadd.s32 1, %s856_s22  ;;  %s162_s27 = sadd.s32 1, %s848_s20 }
   0x6   : > { %p32_p0 = scmp.ge.s32.totalorder %s30_s26, 2  ;;  %p172_p1 = scmp.ne.s32.totalorder %s848_s20, %s844_s19 }
   0x7   : > { %p173_p2 = scmp.eq.s32.totalorder %s607_s24, 1  ;;  %p178_p3 = scmp.ne.s32.totalorder %s844_s19, %s840_s18 }
   0x8   : > { %s1092_s26 = smov (%p32_p0, %s30_s26), 0  ;;  %p179_p5 = scmp.eq.s32.totalorder %s608_s25, 1 }
   0x9   : > { %p936_p4 = por %p173_p2, %p172_p1  ;;  %s159_s29 = ssub.s32 %s856_s22, %s1092_s26 }
   0xa   : > { %p614_p6 = scmp.ge.s32.totalorder %s860_s23, 1  ;;  %p160_p7 = scmp.eq.s32.totalorder %s159_s29, 0 }
   0xb   : > { %p943_p8 = por %p179_p5, %p178_p3  ;;  %p229_p9 = scmp.lt.s32.totalorder %s860_s23, 3 }
   0xc   : > { %s949_s6 = scalar_select %p160_p7, %s848_s20, %s162_s27  }
   0xd   : > { %p230_p10 = pnand %p614_p6, %p229_p9 }
   0xe   : > { %v292_v0 = vld [vmem:[%s1079_s1] sm:$0xff] (!%p230_p10)  ;;  %v293_v1 = vld [vmem:[%s1079_s1 + $0x8] sm:$0xff] (!%p230_p10)  ;;  %v294_v2 = vld [vmem:[%s1079_s1 + $0x10] sm:$0xff] (!%p230_p10)  ;;  %v862_v3 = vmov (!%p230_p10), 0.0|0.0   ;;  %vm863_vm0 = vmmov (!%p230_p10), 0   ;;  %v864_v6 = vmov (!%p230_p10), 0.0  }
   0xf   : > { %233 = sbr.rel (%p230_p10) target bundleno = 496 (0x1f0), region = 40  ;;  %692 = vmatprep.subr.bf16.mxu0 (!%p230_p10), %v862_v3  ;;  %v693_v4 = vpack.c.bf16 (!%p230_p10), %v293_v1, %v292_v0  ;;  %v295_v5 = vld [vmem:[%s1079_s1 + $0x18] sm:$0xff] (!%p230_p10)  ;;  %654 = vmatprep.mubr.msk.f32.mxu0 (!%p230_p10), %vm863_vm0, %v864_v6  ;;  %p268_p11 = scmp.lt.s32.totalorder (!%p230_p10), %s852_s21, 1  ;;  %vm289_vm1 = vcmask (!%p230_p10), 261120   ;;  %v383_v7 = vld [vmem:[%s1081_s3] sm:$0xff] (!%p230_p10)  ;;  %v384_v8 = vld [vmem:[%s1081_s3 + $0x8] sm:$0xff] (!%p230_p10) }
  0x10   : > { %290 = vst.msk [vmem:[#allocation2] sm:$0xff] (!%p230_p10), %vm289_vm1, %v864_v6  ;;  %698 = vmatprep.subr.bf16.mxu1 (!%p230_p10), %v862_v3  ;;  %v699_v9 = vpack.c.bf16 (!%p230_p10), %v384_v8, %v383_v7  ;;  %v385_v10 = vld [vmem:[%s1081_s3 + $0x10] sm:$0xff] (!%p230_p10)  ;;  %v386_v11 = vld [vmem:[%s1081_s3 + $0x18] sm:$0xff] (!%p230_p10)  ;;  %689 = vmatprep.mubr.msk.f32.mxu1 (!%p230_p10), %vm863_vm0, %v864_v6  ;;  %v696_v12 = vpack.c.bf16 (!%p230_p10), %v295_v5, %v294_v2  ;;  %v387_v14 = vld [vmem:[%s1081_s3 + $0x20] sm:$0xff] (!%p230_p10)  ;;  %s621_s13 = sshll.u32 (!%p230_p10), %s852_s21, 7 }
  0x11   : > { %694 = vmatpush3.bf16.msra.mxu0 (!%p230_p10), %v693_v4  ;;  %v702_v13 = vpack.c.bf16 (!%p230_p10), %v386_v11, %v385_v10  ;;  %v388_v15 = vld [vmem:[%s1081_s3 + $0x28] sm:$0xff] (!%p230_p10)  ;;  %v389_v18 = vld [vmem:[%s1081_s3 + $0x30] sm:$0xff] (!%p230_p10)  ;;  %v390_v19 = vld [vmem:[%s1081_s3 + $0x38] sm:$0xff] (!%p230_p10)  ;;  %s1030_s24 = scalar_lea.hbm (!%p230_p10), %s1083_s5, %s621_s13 }
  0x12   : > { %695 = vmatprep.subr.bf16.mxu0 (!%p230_p10), %v862_v3  ;;  %700 = vmatpush3.bf16.msra.mxu1 (!%p230_p10), %v699_v9  ;;  %v705_v17 = vpack.c.bf16 (!%p230_p10), %v388_v15, %v387_v14  ;;  %v708_v20 = vpack.c.bf16 (!%p230_p10), %v390_v19, %v389_v18  ;;  %v391_v21 = vld [vmem:[%s1081_s3 + $0x40] sm:$0xff] (!%p230_p10)  ;;  %v392_v22 = vld [vmem:[%s1081_s3 + $0x48] sm:$0xff] (!%p230_p10)  ;;  %v393_v24 = vld [vmem:[%s1081_s3 + $0x50] sm:$0xff] (!%p230_p10) }
  0x13   : > { %701 = vmatprep.subr.bf16.mxu1 (!%p230_p10), %v862_v3  ;;  %v711_v23 = vpack.c.bf16 (!%p230_p10), %v392_v22, %v391_v21  ;;  %v394_v25 = vld [vmem:[%s1081_s3 + $0x58] sm:$0xff] (!%p230_p10)  ;;  %v395_v27 = vld [vmem:[%s1081_s3 + $0x60] sm:$0xff] (!%p230_p10)  ;;  %v396_v28 = vld [vmem:[%s1081_s3 + $0x68] sm:$0xff] (!%p230_p10) }
  0x14   : > { %v714_v26 = vpack.c.bf16 (!%p230_p10), %v394_v25, %v393_v24  ;;  %v717_v29 = vpack.c.bf16 (!%p230_p10), %v396_v28, %v395_v27  ;;  %v397_v30 = vld [vmem:[%s1081_s3 + $0x70] sm:$0xff] (!%p230_p10)  ;;  %v398_v31 = vld [vmem:[%s1081_s3 + $0x78] sm:$0xff] (!%p230_p10)  ;;  %v617_v33 = vld [vmem:[%s1080_s2] ss:$0 sm:$0xff] (!%p230_p10) }
  0x15   : > { %697 = vmatpush3.bf16.msra.mxu0 (!%p230_p10), %v696_v12  ;;  %v720_v32 = vpack.c.bf16 (!%p230_p10), %v398_v31, %v397_v30  ;;  %v619_v46 = vld [vmem:[%s1082_s4] ss:$0 sm:$0xff] (!%p230_p10) }
  0x16   : > { %s269_s8 = scalar_select %p268_p11, %s852_s21, 1  ;;  %703 = vmatpush3.bf16.msra.mxu1 %v702_v13 }
  0x17   : > { %704 = vmatprep.subr.bf16.mxu1 %v862_v3  ;;  %v382_v42 = vld [vmem:[#allocation2] sm:$0xff]  ;;  %s865_s21 = smov [#allocation3]  }
  0x18   : > { %s616_s9 = sshll.u32 %s269_s8, 3  ;;  %s786_s29 = sshll.u32 %s865_s21, 4  ;;  %s787_s29 = int_to_ptr.vmem [resolvable:$false] %s786_s29 }
  0x19   : > { %s271_s16 = scalar_lea.vmem %s1078_s0, %s616_s9  ;;  %s265_s9 = sand.u32 1, %s844_s19  }
  0x1a   : > { %v291_v16 = vld [vmem:[%s271_s16] sm:$0xff]  ;;  %706 = vmatpush3.bf16.msra.mxu1 %v705_v17  ;;  %s615_s10 = sshll.u32 %s265_s9, 3  ;;  %s485_s25 = scalar_lea.sflag [#allocation4], %s265_s9 }
  0x1b   : > { %655 = vmatmul.mubr.msk.f32.vlgmr.msra.gmra.mrb[0].mxu0 %vm289_vm1, %v291_v16  ;;  %707 = vmatprep.subr.bf16.mxu1 %v862_v3  ;;  %s267_s14 = scalar_lea.vmem [#allocation3], %s615_s10  ;;  %s788_s7 = scalar_lea.vmem %s787_s29, 256 }
  0x1c   : > { %s498_s15 = sshll.u32 %s267_s14, 4  ;;  %s1032_s15 = int_to_ptr.vmem [resolvable:$true] %s498_s15 }
  0x1d   : > { %s782_s27 = scalar_lea.vmem %s1032_s15, 128  ;;  %p789_p1 = scmp.lt.s32.totalorder %s1032_s15, %s787_s29 }
  0x1e   : > { %709 = vmatpush3.bf16.msra.mxu1 %v708_v20  ;;  %p783_p12 = scmp.ne.s32.totalorder %s1032_s15, %s782_s27  ;;  %p790_p2 = scmp.lt.s32.totalorder %s788_s7, %s782_s27 }
  0x1f   : > { %710 = vmatprep.subr.bf16.mxu1 %v862_v3 }
  0x20   : > { %p784_p13 = pnand %p783_p12, %p936_p4  ;;  %p791_p3 = por %p790_p2, %p789_p1 }
  0x22   : > { %712 = vmatpush3.bf16.msra.mxu1 %v711_v23  ;;  %p785_p0 = pneg %p784_p13 }
  0x23   : > { %713 = vmatprep.subr.bf16.mxu1 %v862_v3 }
  0x24   : > { %p792_p5 = pnand %p791_p3, %p785_p0 }
  0x26   : > { %715 = vmatpush3.bf16.msra.mxu1 %v714_v26 }
  0x27   : > { %716 = vmatprep.subr.bf16.mxu1 %v862_v3 }
  0x2a   : > { %718 = vmatpush3.bf16.msra.mxu1 %v717_v29 }
  0x2b   : > { %719 = vmatprep.subr.bf16.mxu1 %v862_v3 }
  0x2e   : > { %721 = vmatpush3.bf16.msra.mxu1 %v720_v32 }
  0xee   : > { %v373_v34 = vpop.f32.mrb[0].mxu0 }
  0xef   : > { %v374_v35 = vadd.f32 %v617_v33, %v373_v34  ;;  %v656_v36 = vpop.f32.mrb[1].mxu0 }
  0xf1   : > { %v378_v37 = vmul.f32 0.70710677, %v374_v35  ;;  %v377_v39 = vmul.f32 0.5, %v374_v35 }
  0xf3   : > { %780 = verf.f32 %v378_v37 }
  0xfd   : > { %v781_v38 = vpop.eup %780 }
  0xfe   : > { %v380_v40 = vadd.f32 1.0, %v781_v38 }
 0x100   : > { %v381_v41 = vmul.f32 %v380_v40, %v377_v39 }
 0x102   : > { %690 = vmatmul.mubr.f32.vlgmr.msra.gmra.mrb[0].mxu1 %v381_v41 }
 0x1d5   : > { %v465_v43 = vpop.f32.mrb[0].mxu1 }
 0x1d6   : > { %v469_v44 = vadd.f32 %v465_v43, %v382_v42  ;;  %v691_v45 = vpop.f32.mrb[1].mxu1 }
 0x1d8   : > { %470 = vst.msk [vmem:[#allocation2] sm:$0xff] %vm289_vm1, %v469_v44 }
 0x1df   : > { %v474_v47 = vld [vmem:[#allocation2] sm:$0xff] }
 0x1e0   : > { %v482_v48 = vadd.f32 %v619_v46, %v474_v47 }
 0x1e2   : > { %483 = vst.msk [vmem:[%s267_s14] sm:$0xff] %vm289_vm1, %v482_v48 }
 0x1e3   : > { %795 = shalt.err (!%p792_p5)
}
 0x1e4   : > { %s796_s8 = scalar_lea.hbm %s1030_s24, 128  ;;  %s800_s11 = scalar_lea.hbm %s1083_s5, 256 }
 0x1e5   : > { %p797_p6 = scmp.ne.s32.totalorder %s1030_s24, %s796_s8  ;;  %p801_p10 = scmp.lt.u32.totalorder %s1030_s24, %s1083_s5 }
 0x1e6   : > { %p802_p11 = scmp.lt.u32.totalorder %s800_s11, %s796_s8  ;;  %p804_p13 = scmp.lt.u32.totalorder %s796_s8, %s1030_s24 }
 0x1e7   : > { %p798_p7 = pnand %p797_p6, %p936_p4 }
 0x1e8   : > { %p803_p12 = por %p802_p11, %p801_p10 }
 0x1e9   : > { %p799_p9 = pneg %p798_p7 }
 0x1ea   : > { %p805_p0 = por %p804_p13, %p803_p12 }
 0x1ec   : > { %p806_p1 = pnand %p805_p0, %p799_p9 }
 0x1ee   : > { %809 = shalt.err (!%p806_p1)
}
 0x1ef   : > { %722 = dma.vmem_to_hbm [thread:$0]  (%p936_p4), %s1032_s15, 128, %s1030_s24, %s485_s25  }
 0x1f0 PF: > { %p728_p2 = scmp.ge.s32.totalorder %s860_s23, 2  ;;  %s510_s14 = sand.u32 1, %s840_s18  }
 0x1f1   : > { %s511_s16 = scalar_lea.sflag [#allocation4], %s510_s14 }
 0x1f2   : > { %p725_p3 = pnand %p728_p2, %p943_p8 }
 0x1f4   : > { %835 = dma.done.wait (!%p725_p3), %s511_s16, 128  }
 0x1f5   : > { %837 = vsyncadd (!%p725_p3), %s511_s16, 4294967168  ;;  %s18_s23 = sadd.s32 1, %s860_s23   ;;  %s1086_s18 = smov %s844_s19 }
 0x1f6   : > { %p15_p5 = scmp.ge.s32.totalorder %s18_s23, 4   ;;  %s1087_s19 = smov %s848_s20 }
 0x1f7   : > { %s1088_s20 = smov %s949_s6  ;;  %s1089_s21 = smov %s856_s22 }
 0x1f8   : > { %s1090_s22 = smov %s1092_s26  ;;  %17 = sbr.rel (!%p15_p5) target bundleno = 4 (0x4), region = 92 }
 0x1ff   :  { %516 = vsyncpa [#allocation4], 1 }
 0x200   :  { %518 = vsyncpa [#allocation4 + $0x1], 1 }

</bundles_post_ra>
